<compile_context>
chip_gen: v7x
topology: tpu7x:2x2x1
jax: 0.10.0
libtpu: 0.0.40
codegen_flags: <defaults>
</compile_context>

<pallas_src>
import jax
import jax.numpy as jnp
from jax import lax
from jax.experimental import pallas as pl
from jax.experimental.pallas import tpu as pltpu

_INV_SQRT2 = 0.7071067811865475
_LN_EPS = 1e-5                       # nn.LayerNorm default
_VMEM_TILE_BUDGET = 40 << 20         # target working-set bytes (fits v7x 64 MiB/TC)


def _gelu_exact(x):
    # nn.GELU() default: exact erf formulation
    return 0.5 * x * (1.0 + lax.erf(x * _INV_SQRT2))


def _round_up(v, m):
    return ((v + m - 1) // m) * m


# -------------------- fused MLPHead kernel (one batch tile per grid step) -------------------
def _mlp_head_kernel(x_ref, wp_ref, bp_ref, wf_ref, bf_ref, g_ref, b_ref, o_ref):
    x = x_ref[...]
    if x.dtype != jnp.bfloat16:               # bf16 MXU operands, f32 accumulation
        x = x.astype(jnp.bfloat16)

    # projection = Linear(E, P)
    proj = jnp.dot(x, wp_ref[...], preferred_element_type=jnp.float32) + bp_ref[...]

    # GELU -> fc = Linear(P, P)
    h = _gelu_exact(proj)
    h = jnp.dot(h.astype(jnp.bfloat16), wf_ref[...],
                preferred_element_type=jnp.float32) + bf_ref[...]

    # dropout == identity at inference; residual add
    y = h + proj

    # LayerNorm(P, eps=1e-5)
    mean = jnp.mean(y, axis=-1, keepdims=True)
    yc = y - mean
    var = jnp.mean(yc * yc, axis=-1, keepdims=True)
    yn = yc * lax.rsqrt(var + _LN_EPS)
    o_ref[...] = (yn * g_ref[...] + b_ref[...]).astype(o_ref.dtype)


# -------------------- VMEM bookkeeping / tile selection --------------------------------------
def _tile_footprint_bytes(tb, E, P, x_bytes, out_bytes):
    weights = 2 * (E * P + P * P) + 8 * P * 4          # bf16 weights + f32 biases/LN params
    io = 2 * tb * E * x_bytes + 2 * tb * P * out_bytes  # double-buffered x / out tiles
    temps = tb * E * 2 + 6 * tb * P * 4                 # in-kernel bf16 cast + f32 intermediates
    return weights + io + temps


def _choose_tb(B, E, P, x_bytes, out_bytes, block_b):
    tb = max(8, _round_up(min(block_b, _round_up(max(B, 1), 8)), 8))
    # v7x megacore: make sure there are >= 2 grid steps when the batch allows it.
    if B >= 16 and pl.cdiv(B, tb) < 2:
        tb = max(8, _round_up(pl.cdiv(B, 2), 8))
    # Shrink until the working set fits the VMEM budget.
    while tb > 8 and _tile_footprint_bytes(tb, E, P, x_bytes, out_bytes) > _VMEM_TILE_BUDGET:
        tb = max(8, _round_up(tb // 2, 8))
    return tb


# -------------------- wrapper ---------------------------------------------------------------
def mlp_head_forward(x, p, *, block_b=512, out_dtype=None):
    B, E = x.shape
    P = p["w_proj"].shape[1]
    out_dtype = x.dtype if out_dtype is None else out_dtype

    # Weights resident in bf16 (MXU-native, half the DMA + VMEM); keep bias / LN params f32.
    wp = p["w_proj"].astype(jnp.bfloat16)
    wf = p["w_fc"].astype(jnp.bfloat16)
    bp = p["b_proj"].astype(jnp.float32)
    bf = p["b_fc"].astype(jnp.float32)
    g = p["ln_gamma"].astype(jnp.float32)
    b = p["ln_beta"].astype(jnp.float32)

    x_bytes = x.dtype.itemsize
    out_bytes = jnp.dtype(out_dtype).itemsize
    tb = _choose_tb(B, E, P, x_bytes, out_bytes, block_b)
    grid = (pl.cdiv(B, tb),)   # no wrapper pad/slice; Pallas masks the partial last block

    footprint = _tile_footprint_bytes(tb, E, P, x_bytes, out_bytes)
    vmem_limit = min(max(int(footprint * 1.25) + (4 << 20), 32 << 20), 64 << 20)

    const = lambda i: (0, 0)

    def run(single_buffer_weights):
        w_kw = dict(pipeline_mode=pl.Buffered(1)) if single_buffer_weights else {}
        call = pl.pallas_call(
            _mlp_head_kernel,
            grid=grid,
            in_specs=[
                pl.BlockSpec((tb, E), lambda i: (i, 0)),        # x tile (pipelined over batch)
                pl.BlockSpec((E, P), const, **w_kw),            # w_proj (invariant, resident)
                pl.BlockSpec((1, P), const, **w_kw),            # b_proj
                pl.BlockSpec((P, P), const, **w_kw),            # w_fc   (invariant, resident)
                pl.BlockSpec((1, P), const, **w_kw),            # b_fc
                pl.BlockSpec((1, P), const, **w_kw),            # ln gamma
                pl.BlockSpec((1, P), const, **w_kw),            # ln beta
            ],
            out_specs=pl.BlockSpec((tb, P), lambda i: (i, 0)),  # lane-dense (P % 128 == 0 typical)
            out_shape=jax.ShapeDtypeStruct((B, P), out_dtype),
            compiler_params=pltpu.CompilerParams(
                dimension_semantics=("parallel",),              # batch tiles are independent
                vmem_limit_bytes=vmem_limit,
            ),
        )
        return call(x, wp, bp, wf, bf, g, b)

    try:
        # Preferred path: invariant operands single-buffered (halves resident-weight VMEM).
        return run(True)
    except Exception:
        # Fallback for jax versions that reject pipeline_mode=pl.Buffered(1).
        return run(False)


# -------------------- params + references ----------------------------------------------------
def init_params(key, E, P):
    ks = jax.random.split(key, 4)

    def u(k, shape, fan_in):
        bound = 1.0 / float(fan_in) ** 0.5
        return jax.random.uniform(k, shape, jnp.float32, -bound, bound)

    return dict(
        # weights stored as [in_features, out_features] (transpose of torch Linear.weight)
        w_proj=u(ks[0], (E, P), E), b_proj=u(ks[1], (1, P), E),
        w_fc=u(ks[2], (P, P), P),   b_fc=u(ks[3], (1, P), P),
        ln_gamma=jnp.ones((1, P), jnp.float32),
        ln_beta=jnp.zeros((1, P), jnp.float32),
    )


def reference_forward_f32(x, p):
    # Pure-f32 reference (matches the PyTorch module in f32).
    proj = x @ p["w_proj"] + p["b_proj"]
    h = _gelu_exact(proj)
    h = h @ p["w_fc"] + p["b_fc"]
    y = h + proj                       # dropout == identity at inference
    mean = y.mean(-1, keepdims=True)
    var = ((y - mean) ** 2).mean(-1, keepdims=True)
    return (y - mean) / jnp.sqrt(var + _LN_EPS) * p["ln_gamma"] + p["ln_beta"]


def reference_forward_matched(x, p):
    # Same bf16-operand / f32-accumulation arithmetic as the kernel (for tight comparison).
    wp = p["w_proj"].astype(jnp.bfloat16)
    wf = p["w_fc"].astype(jnp.bfloat16)
    proj = jnp.dot(x.astype(jnp.bfloat16), wp,
                   preferred_element_type=jnp.float32) + p["b_proj"]
    h = _gelu_exact(proj)
    h = jnp.dot(h.astype(jnp.bfloat16), wf,
                preferred_element_type=jnp.float32) + p["b_fc"]
    y = h + proj
    mean = y.mean(-1, keepdims=True)
    yc = y - mean
    var = (yc * yc).mean(-1, keepdims=True)
    return yc * lax.rsqrt(var + _LN_EPS) * p["ln_gamma"] + p["ln_beta"]


if __name__ == "__main__":
    key = jax.random.PRNGKey(0)
    # (B, E, P): small primary config + a larger one exercising multi-step grid & partial block.
    for (B, E, P) in [(2, 256, 128), (300, 512, 256)]:
        key, kx, kp = jax.random.split(key, 3)
        x = jax.random.normal(kx, (B, E), jnp.float32)
        params = init_params(kp, E, P)

        out = jax.block_until_ready(mlp_head_forward(x, params))
        assert out.shape == (B, P), out.shape

        ref_m = reference_forward_matched(x, params)   # same bf16 matmul arithmetic
        ref_f = reference_forward_f32(x, params)       # pure f32 semantics
        err_m = float(jnp.max(jnp.abs(out - ref_m)))
        err_f = float(jnp.max(jnp.abs(out - ref_f)))
        assert jnp.allclose(out, ref_m, rtol=2e-3, atol=2e-3), (B, E, P, err_m)
        assert jnp.allclose(out, ref_f, rtol=5e-2, atol=5e-2), (B, E, P, err_f)

    print("KERNEL_OK")
</pallas_src>

<mosaic_0001>
module attributes {stable_mosaic.version = 11 : i64} {
  func.func @_mlp_head_kernel(%arg0: i32, %arg1: memref<8x256xf32, #tpu.memory_space<vmem>>, %arg2: memref<256x128xbf16, #tpu.memory_space<vmem>>, %arg3: memref<1x128xf32, #tpu.memory_space<vmem>>, %arg4: memref<128x128xbf16, #tpu.memory_space<vmem>>, %arg5: memref<1x128xf32, #tpu.memory_space<vmem>>, %arg6: memref<1x128xf32, #tpu.memory_space<vmem>>, %arg7: memref<1x128xf32, #tpu.memory_space<vmem>>, %arg8: memref<8x128xf32, #tpu.memory_space<vmem>>) attributes {dimension_semantics = [#tpu.dimension_semantics<parallel>], iteration_bounds = array<i64: 1>, scalar_prefetch = 0 : i64, scratch_operands = 0 : i64, tpu.core_type = #tpu.core_type<tc>, window_params = [{transform_indices = @transform_0, window_bounds = array<i64: 8, 256>}, {pipeline_mode = #tpu.pipeline_mode<synchronous>, transform_indices = @transform_1, window_bounds = array<i64: 256, 128>}, {pipeline_mode = #tpu.pipeline_mode<synchronous>, transform_indices = @transform_2, window_bounds = array<i64: 1, 128>}, {pipeline_mode = #tpu.pipeline_mode<synchronous>, transform_indices = @transform_3, window_bounds = array<i64: 128, 128>}, {pipeline_mode = #tpu.pipeline_mode<synchronous>, transform_indices = @transform_4, window_bounds = array<i64: 1, 128>}, {pipeline_mode = #tpu.pipeline_mode<synchronous>, transform_indices = @transform_5, window_bounds = array<i64: 1, 128>}, {pipeline_mode = #tpu.pipeline_mode<synchronous>, transform_indices = @transform_6, window_bounds = array<i64: 1, 128>}, {transform_indices = @transform_7, window_bounds = array<i64: 8, 128>}]} {
    %c0 = arith.constant 0 : index
    %c0_0 = arith.constant 0 : index
    %0 = vector.load %arg1[%c0, %c0_0] : memref<8x256xf32, #tpu.memory_space<vmem>>, vector<8x256xf32>
    %1 = arith.truncf %0 : vector<8x256xf32> to vector<8x256xbf16>
    %c0_1 = arith.constant 0 : index
    %c0_2 = arith.constant 0 : index
    %2 = vector.load %arg2[%c0_1, %c0_2] : memref<256x128xbf16, #tpu.memory_space<vmem>>, vector<256x128xbf16>
    %cst = arith.constant dense<0.000000e+00> : vector<8x128xf32>
    %3 = tpu.matmul %1, %2, %cst {dimension_numbers = #tpu.dot_dimension_numbers<[1], [0], [0], [1], [0, 0, 1, 1], [], []>} : vector<8x256xbf16>, vector<256x128xbf16>, vector<8x128xf32> -> vector<8x128xf32>
    %c0_3 = arith.constant 0 : index
    %c0_4 = arith.constant 0 : index
    %4 = vector.load %arg3[%c0_3, %c0_4] : memref<1x128xf32, #tpu.memory_space<vmem>>, vector<1x128xf32>
    %5 = vector.broadcast %4 : vector<1x128xf32> to vector<8x128xf32>
    %6 = arith.addf %3, %5 : vector<8x128xf32>
    %cst_5 = arith.constant 5.000000e-01 : f32
    %7 = vector.broadcast %cst_5 : f32 to vector<8x128xf32>
    %8 = arith.mulf %7, %6 : vector<8x128xf32>
    %cst_6 = arith.constant 0.707106769 : f32
    %9 = vector.broadcast %cst_6 : f32 to vector<8x128xf32>
    %10 = arith.mulf %6, %9 : vector<8x128xf32>
    %11 = math.erf %10 : vector<8x128xf32>
    %cst_7 = arith.constant 1.000000e+00 : f32
    %12 = vector.broadcast %cst_7 : f32 to vector<8x128xf32>
    %13 = arith.addf %12, %11 : vector<8x128xf32>
    %14 = arith.mulf %8, %13 : vector<8x128xf32>
    %15 = arith.truncf %14 : vector<8x128xf32> to vector<8x128xbf16>
    %c0_8 = arith.constant 0 : index
    %c0_9 = arith.constant 0 : index
    %16 = vector.load %arg4[%c0_8, %c0_9] : memref<128x128xbf16, #tpu.memory_space<vmem>>, vector<128x128xbf16>
    %cst_10 = arith.constant dense<0.000000e+00> : vector<8x128xf32>
    %17 = tpu.matmul %15, %16, %cst_10 {dimension_numbers = #tpu.dot_dimension_numbers<[1], [0], [0], [1], [0, 0, 1, 1], [], []>} : vector<8x128xbf16>, vector<128x128xbf16>, vector<8x128xf32> -> vector<8x128xf32>
    %c0_11 = arith.constant 0 : index
    %c0_12 = arith.constant 0 : index
    %18 = vector.load %arg5[%c0_11, %c0_12] : memref<1x128xf32, #tpu.memory_space<vmem>>, vector<1x128xf32>
    %19 = vector.broadcast %18 : vector<1x128xf32> to vector<8x128xf32>
    %20 = arith.addf %17, %19 : vector<8x128xf32>
    %21 = arith.addf %20, %6 : vector<8x128xf32>
    %cst_13 = arith.constant dense<0.000000e+00> : vector<8xf32>
    %22 = vector.multi_reduction <add>, %21, %cst_13 [1] : vector<8x128xf32> to vector<8xf32>
    %23 = vector.shape_cast %22 : vector<8xf32> to vector<8x1xf32>
    %cst_14 = arith.constant 1.280000e+02 : f32
    %24 = vector.broadcast %cst_14 : f32 to vector<8x1xf32>
    %25 = arith.divf %23, %24 : vector<8x1xf32>
    %26 = vector.broadcast %25 : vector<8x1xf32> to vector<8x128xf32>
    %27 = arith.subf %21, %26 : vector<8x128xf32>
    %28 = arith.mulf %27, %27 : vector<8x128xf32>
    %cst_15 = arith.constant dense<0.000000e+00> : vector<8xf32>
    %29 = vector.multi_reduction <add>, %28, %cst_15 [1] : vector<8x128xf32> to vector<8xf32>
    %30 = vector.shape_cast %29 : vector<8xf32> to vector<8x1xf32>
    %cst_16 = arith.constant 1.280000e+02 : f32
    %31 = vector.broadcast %cst_16 : f32 to vector<8x1xf32>
    %32 = arith.divf %30, %31 : vector<8x1xf32>
    %cst_17 = arith.constant 9.99999974E-6 : f32
    %33 = vector.broadcast %cst_17 : f32 to vector<8x1xf32>
    %34 = arith.addf %32, %33 : vector<8x1xf32>
    %35 = math.rsqrt %34 : vector<8x1xf32>
    %36 = vector.broadcast %35 : vector<8x1xf32> to vector<8x128xf32>
    %37 = arith.mulf %27, %36 : vector<8x128xf32>
    %c0_18 = arith.constant 0 : index
    %c0_19 = arith.constant 0 : index
    %38 = vector.load %arg6[%c0_18, %c0_19] : memref<1x128xf32, #tpu.memory_space<vmem>>, vector<1x128xf32>
    %39 = vector.broadcast %38 : vector<1x128xf32> to vector<8x128xf32>
    %40 = arith.mulf %37, %39 : vector<8x128xf32>
    %c0_20 = arith.constant 0 : index
    %c0_21 = arith.constant 0 : index
    %41 = vector.load %arg7[%c0_20, %c0_21] : memref<1x128xf32, #tpu.memory_space<vmem>>, vector<1x128xf32>
    %42 = vector.broadcast %41 : vector<1x128xf32> to vector<8x128xf32>
    %43 = arith.addf %40, %42 : vector<8x128xf32>
    %c0_22 = arith.constant 0 : index
    %c0_23 = arith.constant 0 : index
    %44 = vector.load %arg8[%c0_22, %c0_23] : memref<8x128xf32, #tpu.memory_space<vmem>>, vector<8x128xf32>
    tpu.vector_store %arg8[%c0_22, %c0_23], %43 {strides = array<i32>} : memref<8x128xf32, #tpu.memory_space<vmem>>, vector<8x128xf32>,
    return
  }
  func.func @transform_0(%arg0: i32) -> (i32, i32) {
    %c0_i32 = arith.constant 0 : i32
    %c0_i32_0 = arith.constant 0 : i32
    return %arg0, %c0_i32 : i32, i32
  }
  func.func @transform_1(%arg0: i32) -> (i32, i32) {
    %c0_i32 = arith.constant 0 : i32
    %c0_i32_0 = arith.constant 0 : i32
    %c0_i32_1 = arith.constant 0 : i32
    return %c0_i32, %c0_i32_0 : i32, i32
  }
  func.func @transform_2(%arg0: i32) -> (i32, i32) {
    %c0_i32 = arith.constant 0 : i32
    %c0_i32_0 = arith.constant 0 : i32
    %c0_i32_1 = arith.constant 0 : i32
    return %c0_i32, %c0_i32_0 : i32, i32
  }
  func.func @transform_3(%arg0: i32) -> (i32, i32) {
    %c0_i32 = arith.constant 0 : i32
    %c0_i32_0 = arith.constant 0 : i32
    %c0_i32_1 = arith.constant 0 : i32
    return %c0_i32, %c0_i32_0 : i32, i32
  }
  func.func @transform_4(%arg0: i32) -> (i32, i32) {
    %c0_i32 = arith.constant 0 : i32
    %c0_i32_0 = arith.constant 0 : i32
    %c0_i32_1 = arith.constant 0 : i32
    return %c0_i32, %c0_i32_0 : i32, i32
  }
  func.func @transform_5(%arg0: i32) -> (i32, i32) {
    %c0_i32 = arith.constant 0 : i32
    %c0_i32_0 = arith.constant 0 : i32
    %c0_i32_1 = arith.constant 0 : i32
    return %c0_i32, %c0_i32_0 : i32, i32
  }
  func.func @transform_6(%arg0: i32) -> (i32, i32) {
    %c0_i32 = arith.constant 0 : i32
    %c0_i32_0 = arith.constant 0 : i32
    %c0_i32_1 = arith.constant 0 : i32
    return %c0_i32, %c0_i32_0 : i32, i32
  }
  func.func @transform_7(%arg0: i32) -> (i32, i32) {
    %c0_i32 = arith.constant 0 : i32
    %c0_i32_0 = arith.constant 0 : i32
    return %arg0, %c0_i32 : i32, i32
  }
}

module attributes {stable_mosaic.version = 11 : i64} {
  func.func @_mlp_head_kernel(%arg0: i32, %arg1: memref<8x256xf32, #tpu.memory_space<vmem>>, %arg2: memref<256x128xbf16, #tpu.memory_space<vmem>>, %arg3: memref<1x128xf32, #tpu.memory_space<vmem>>, %arg4: memref<128x128xbf16, #tpu.memory_space<vmem>>, %arg5: memref<1x128xf32, #tpu.memory_space<vmem>>, %arg6: memref<1x128xf32, #tpu.memory_space<vmem>>, %arg7: memref<1x128xf32, #tpu.memory_space<vmem>>, %arg8: memref<8x128xf32, #tpu.memory_space<vmem>>) attributes {dimension_semantics = [#tpu.dimension_semantics<parallel>], iteration_bounds = array<i64: 1>, scalar_prefetch = 0 : i64, scratch_operands = 0 : i64, tpu.core_type = #tpu.core_type<tc>, window_params = [{transform_indices = @transform_0, window_bounds = array<i64: 8, 256>}, {pipeline_mode = #tpu.pipeline_mode<synchronous>, transform_indices = @transform_1, window_bounds = array<i64: 256, 128>}, {pipeline_mode = #tpu.pipeline_mode<synchronous>, transform_indices = @transform_2, window_bounds = array<i64: 1, 128>}, {pipeline_mode = #tpu.pipeline_mode<synchronous>, transform_indices = @transform_3, window_bounds = array<i64: 128, 128>}, {pipeline_mode = #tpu.pipeline_mode<synchronous>, transform_indices = @transform_4, window_bounds = array<i64: 1, 128>}, {pipeline_mode = #tpu.pipeline_mode<synchronous>, transform_indices = @transform_5, window_bounds = array<i64: 1, 128>}, {pipeline_mode = #tpu.pipeline_mode<synchronous>, transform_indices = @transform_6, window_bounds = array<i64: 1, 128>}, {transform_indices = @transform_7, window_bounds = array<i64: 8, 128>}]} {
    %c0 = arith.constant 0 : index
    %c0_0 = arith.constant 0 : index
    %0 = vector.load %arg1[%c0, %c0_0] : memref<8x256xf32, #tpu.memory_space<vmem>>, vector<8x256xf32>
    %1 = arith.truncf %0 : vector<8x256xf32> to vector<8x256xbf16>
    %c0_1 = arith.constant 0 : index
    %c0_2 = arith.constant 0 : index
    %2 = vector.load %arg2[%c0_1, %c0_2] : memref<256x128xbf16, #tpu.memory_space<vmem>>, vector<256x128xbf16>
    %cst = arith.constant dense<0.000000e+00> : vector<8x128xf32>
    %3 = tpu.matmul %1, %2, %cst {dimension_numbers = #tpu.dot_dimension_numbers<[1], [0], [0], [1], [0, 0, 1, 1], [], []>} : vector<8x256xbf16>, vector<256x128xbf16>, vector<8x128xf32> -> vector<8x128xf32>
    %c0_3 = arith.constant 0 : index
    %c0_4 = arith.constant 0 : index
    %4 = vector.load %arg3[%c0_3, %c0_4] : memref<1x128xf32, #tpu.memory_space<vmem>>, vector<1x128xf32>
    %5 = vector.broadcast %4 : vector<1x128xf32> to vector<8x128xf32>
    %6 = arith.addf %3, %5 : vector<8x128xf32>
    %cst_5 = arith.constant 5.000000e-01 : f32
    %7 = vector.broadcast %cst_5 : f32 to vector<8x128xf32>
    %8 = arith.mulf %7, %6 : vector<8x128xf32>
    %cst_6 = arith.constant 0.707106769 : f32
    %9 = vector.broadcast %cst_6 : f32 to vector<8x128xf32>
    %10 = arith.mulf %6, %9 : vector<8x128xf32>
    %11 = math.erf %10 : vector<8x128xf32>
    %cst_7 = arith.constant 1.000000e+00 : f32
    %12 = vector.broadcast %cst_7 : f32 to vector<8x128xf32>
    %13 = arith.addf %12, %11 : vector<8x128xf32>
    %14 = arith.mulf %8, %13 : vector<8x128xf32>
    %15 = arith.truncf %14 : vector<8x128xf32> to vector<8x128xbf16>
    %c0_8 = arith.constant 0 : index
    %c0_9 = arith.constant 0 : index
    %16 = vector.load %arg4[%c0_8, %c0_9] : memref<128x128xbf16, #tpu.memory_space<vmem>>, vector<128x128xbf16>
    %cst_10 = arith.constant dense<0.000000e+00> : vector<8x128xf32>
    %17 = tpu.matmul %15, %16, %cst_10 {dimension_numbers = #tpu.dot_dimension_numbers<[1], [0], [0], [1], [0, 0, 1, 1], [], []>} : vector<8x128xbf16>, vector<128x128xbf16>, vector<8x128xf32> -> vector<8x128xf32>
    %c0_11 = arith.constant 0 : index
    %c0_12 = arith.constant 0 : index
    %18 = vector.load %arg5[%c0_11, %c0_12] : memref<1x128xf32, #tpu.memory_space<vmem>>, vector<1x128xf32>
    %19 = vector.broadcast %18 : vector<1x128xf32> to vector<8x128xf32>
    %20 = arith.addf %17, %19 : vector<8x128xf32>
    %21 = arith.addf %20, %6 : vector<8x128xf32>
    %cst_13 = arith.constant dense<0.000000e+00> : vector<8xf32>
    %22 = vector.multi_reduction <add>, %21, %cst_13 [1] : vector<8x128xf32> to vector<8xf32>
    %23 = vector.shape_cast %22 : vector<8xf32> to vector<8x1xf32>
    %cst_14 = arith.constant 1.280000e+02 : f32
    %24 = vector.broadcast %cst_14 : f32 to vector<8x1xf32>
    %25 = arith.divf %23, %24 : vector<8x1xf32>
    %26 = vector.broadcast %25 : vector<8x1xf32> to vector<8x128xf32>
    %27 = arith.subf %21, %26 : vector<8x128xf32>
    %28 = arith.mulf %27, %27 : vector<8x128xf32>
    %cst_15 = arith.constant dense<0.000000e+00> : vector<8xf32>
    %29 = vector.multi_reduction <add>, %28, %cst_15 [1] : vector<8x128xf32> to vector<8xf32>
    %30 = vector.shape_cast %29 : vector<8xf32> to vector<8x1xf32>
    %cst_16 = arith.constant 1.280000e+02 : f32
    %31 = vector.broadcast %cst_16 : f32 to vector<8x1xf32>
    %32 = arith.divf %30, %31 : vector<8x1xf32>
    %cst_17 = arith.constant 9.99999974E-6 : f32
    %33 = vector.broadcast %cst_17 : f32 to vector<8x1xf32>
    %34 = arith.addf %32, %33 : vector<8x1xf32>
    %35 = math.rsqrt %34 : vector<8x1xf32>
    %36 = vector.broadcast %35 : vector<8x1xf32> to vector<8x128xf32>
    %37 = arith.mulf %27, %36 : vector<8x128xf32>
    %c0_18 = arith.constant 0 : index
    %c0_19 = arith.constant 0 : index
    %38 = vector.load %arg6[%c0_18, %c0_19] : memref<1x128xf32, #tpu.memory_space<vmem>>, vector<1x128xf32>
    %39 = vector.broadcast %38 : vector<1x128xf32> to vector<8x128xf32>
    %40 = arith.mulf %37, %39 : vector<8x128xf32>
    %c0_20 = arith.constant 0 : index
    %c0_21 = arith.constant 0 : index
    %41 = vector.load %arg7[%c0_20, %c0_21] : memref<1x128xf32, #tpu.memory_space<vmem>>, vector<1x128xf32>
    %42 = vector.broadcast %41 : vector<1x128xf32> to vector<8x128xf32>
    %43 = arith.addf %40, %42 : vector<8x128xf32>
    %c0_22 = arith.constant 0 : index
    %c0_23 = arith.constant 0 : index
    %44 = vector.load %arg8[%c0_22, %c0_23] : memref<8x128xf32, #tpu.memory_space<vmem>>, vector<8x128xf32>
    tpu.vector_store %arg8[%c0_22, %c0_23], %43 {strides = array<i32>} : memref<8x128xf32, #tpu.memory_space<vmem>>, vector<8x128xf32>,
    return
  }
  func.func @transform_0(%arg0: i32) -> (i32, i32) {
    %c0_i32 = arith.constant 0 : i32
    %c0_i32_0 = arith.constant 0 : i32
    return %arg0, %c0_i32 : i32, i32
  }
  func.func @transform_1(%arg0: i32) -> (i32, i32) {
    %c0_i32 = arith.constant 0 : i32
    %c0_i32_0 = arith.constant 0 : i32
    %c0_i32_1 = arith.constant 0 : i32
    return %c0_i32, %c0_i32_0 : i32, i32
  }
  func.func @transform_2(%arg0: i32) -> (i32, i32) {
    %c0_i32 = arith.constant 0 : i32
    %c0_i32_0 = arith.constant 0 : i32
    %c0_i32_1 = arith.constant 0 : i32
    return %c0_i32, %c0_i32_0 : i32, i32
  }
  func.func @transform_3(%arg0: i32) -> (i32, i32) {
    %c0_i32 = arith.constant 0 : i32
    %c0_i32_0 = arith.constant 0 : i32
    %c0_i32_1 = arith.constant 0 : i32
    return %c0_i32, %c0_i32_0 : i32, i32
  }
  func.func @transform_4(%arg0: i32) -> (i32, i32) {
    %c0_i32 = arith.constant 0 : i32
    %c0_i32_0 = arith.constant 0 : i32
    %c0_i32_1 = arith.constant 0 : i32
    return %c0_i32, %c0_i32_0 : i32, i32
  }
  func.func @transform_5(%arg0: i32) -> (i32, i32) {
    %c0_i32 = arith.constant 0 : i32
    %c0_i32_0 = arith.constant 0 : i32
    %c0_i32_1 = arith.constant 0 : i32
    return %c0_i32, %c0_i32_0 : i32, i32
  }
  func.func @transform_6(%arg0: i32) -> (i32, i32) {
    %c0_i32 = arith.constant 0 : i32
    %c0_i32_0 = arith.constant 0 : i32
    %c0_i32_1 = arith.constant 0 : i32
    return %c0_i32, %c0_i32_0 : i32, i32
  }
  func.func @transform_7(%arg0: i32) -> (i32, i32) {
    %c0_i32 = arith.constant 0 : i32
    %c0_i32_0 = arith.constant 0 : i32
    return %arg0, %c0_i32 : i32, i32
  }
}

</mosaic_0001>

<bundles_post_ra>
// kernel: tpu_custom_call.1
= control target key start
LH: loop header
LB: loop body
LE: loop exit
PB: predicated region body
PF: predicated region fallthrough
CT: control target
= control target key end

     0   :  { %12 = vsyncpa [#allocation3], 0  ;;  %s791_s0 = inlined_call_operand.hbm [shape: f32[2,256], index: 0, kind: input, shape index: {}]   ;;  %s792_s1 = inlined_call_operand.hbm [shape: bf16[256,128], index: 1, kind: input, shape index: {}]   ;;  %s793_s2 = inlined_call_operand.vmem [shape: f32[1,128], index: 2, kind: input, shape index: {}]   ;;  %s794_s3 = inlined_call_operand.hbm [shape: bf16[128,128], index: 3, kind: input, shape index: {}]   ;;  %s795_s4 = inlined_call_operand.vmem [shape: f32[1,128], index: 4, kind: input, shape index: {}]   ;;  %s796_s5 = inlined_call_operand.vmem [shape: f32[1,128], index: 5, kind: input, shape index: {}]   ;;  %s797_s6 = inlined_call_operand.vmem [shape: f32[1,128], index: 6, kind: input, shape index: {}]   ;;  %s798_s7 = inlined_call_operand.hbm [shape: f32[2,128], index: 7, kind: output, shape index: {}]  }
   0x1   :  { %13 = vsyncpa [#allocation6], 0 }
   0x2   :  { %14 = vsyncpa [#allocation4], 0 }
   0x3   :  { %19 = vsyncadd [#allocation3], 192  ;;  %s655_s24 = smov [#allocation5]   ;;  %s656_s26 = smov [#allocation2]  }
   0x4   :  { %s32_s25 = sshll.u32 %s655_s24, 4  ;;  %s20_s27 = sshll.u32 %s656_s26, 4  ;;  %s33_s25 = int_to_ptr.vmem [resolvable:$true] %s32_s25  ;;  %s705_s27 = int_to_ptr.vmem [resolvable:$true] %s20_s27 }
   0x5   :  { %s561_s30 = scalar_lea.hbm %s792_s1, 2048 }
   0x6   :  { %p562_p0 = scmp.ne.s32.totalorder %s792_s1, %s561_s30  ;;  %p565_p1 = scmp.lt.u32.totalorder %s561_s30, %s792_s1 }
   0x8   :  { %p567_p2 = pnand %p565_p1, %p562_p0 }
   0xa   :  { %570 = shalt.err (!%p567_p2)
}
   0xb   :  { %s571_s12 = scalar_lea.vmem %s33_s25, 2048  ;;  %p576_p4 = scmp.lt.s32.totalorder %s33_s25, %s33_s25 }
   0xc   :  { %p572_p3 = scmp.ne.s32.totalorder %s33_s25, %s571_s12  ;;  %p577_p5 = scmp.lt.s32.totalorder %s571_s12, %s571_s12 }
   0xe   :  { %p578_p6 = por %p577_p5, %p576_p4 }
  0x10   :  { %p579_p7 = pnand %p578_p6, %p572_p3 }
  0x12   :  { %582 = shalt.err (!%p579_p7)
}
  0x13   :  { %s657_s13 = smov 64   ;;  %s658_s14 = smov 4  }
  0x14   :  { %38 = dma.hbm_to_vmem [thread:$0]  %s792_s1, 2048, %s33_s25, [#allocation6], %s657_s13, %s657_s13, %s658_s14  }
  0x15   :  { %s583_s19 = scalar_lea.hbm %s791_s0, 64 }
  0x16   :  { %p584_p8 = scmp.ne.s32.totalorder %s791_s0, %s583_s19  ;;  %p587_p9 = scmp.lt.u32.totalorder %s583_s19, %s791_s0 }
  0x18   :  { %p589_p10 = pnand %p587_p9, %p584_p8 }
  0x1a   :  { %592 = shalt.err (!%p589_p10)
}
  0x1b   :  { %s593_s24 = scalar_lea.vmem %s705_s27, 64  ;;  %s597_s1 = scalar_lea.vmem %s705_s27, 256 }
  0x1c   :  { %p594_p11 = scmp.ne.s32.totalorder %s705_s27, %s593_s24  ;;  %p598_p12 = scmp.lt.s32.totalorder %s705_s27, %s705_s27 }
  0x1d   :  { %p599_p13 = scmp.lt.s32.totalorder %s597_s1, %s593_s24 }
  0x1f   :  { %p600_p0 = por %p599_p13, %p598_p12 }
  0x21   :  { %p601_p1 = pnand %p600_p0, %p594_p11 }
  0x23   :  { %604 = shalt.err (!%p601_p1)
}
  0x24   :  { %26 = dma.hbm_to_vmem [thread:$0]  %s791_s0, 64, %s705_s27, [#allocation3], %s657_s13, %s657_s13, %s658_s14  }
  0x25   :  { %s659_s28 = smov [#allocation7]   ;;  %s605_s9 = scalar_lea.hbm %s794_s3, 1024 }
  0x26   :  { %s46_s29 = sshll.u32 %s659_s28, 4  ;;  %p606_p2 = scmp.ne.s32.totalorder %s794_s3, %s605_s9  ;;  %s47_s29 = int_to_ptr.vmem [resolvable:$true] %s46_s29 }
  0x27   :  { %p609_p3 = scmp.lt.u32.totalorder %s605_s9, %s794_s3 }
  0x29   :  { %p611_p4 = pnand %p609_p3, %p606_p2 }
  0x2b   :  { %614 = shalt.err (!%p611_p4)
}
  0x2c   :  { %s615_s16 = scalar_lea.vmem %s47_s29, 1024  ;;  %p620_p6 = scmp.lt.s32.totalorder %s47_s29, %s47_s29 }
  0x2d   :  { %p616_p5 = scmp.ne.s32.totalorder %s47_s29, %s615_s16  ;;  %p621_p7 = scmp.lt.s32.totalorder %s615_s16, %s615_s16 }
  0x2f   :  { %p622_p8 = por %p621_p7, %p620_p6 }
  0x31   :  { %p623_p9 = pnand %p622_p8, %p616_p5 }
  0x33   :  { %626 = shalt.err (!%p623_p9)
}
  0x34   :  { %52 = dma.hbm_to_vmem [thread:$0]  %s794_s3, 1024, %s47_s29, [#allocation6], %s657_s13, %s657_s13, %s658_s14  }
  0x35   :  { %649 = dma.done.wait [#allocation3], 256  }
  0x36   :  { %650 = vsyncadd [#allocation3], 4294967040 }
  0x37   :  { %651 = dma.done.wait [#allocation6], 3072  }
  0x38   :  { %652 = vsyncadd [#allocation6], 4294964224  ;;  %v660_v0 = vmov 0.0   ;;  %v529_v1 = vld [vmem:[#allocation5 + $0x40] sm:$0xff]   ;;  %v531_v3 = vld [vmem:[#allocation5 + $0x48] sm:$0xff]   ;;  %vm661_vm0 = vmmov 0  }
  0x39   :  { %498 = vmatprep.subr.bf16.mxu1 %v660_v0  ;;  %v530_v2 = vld [vmem:[#allocation5] sm:$0xff]   ;;  %467 = vmatprep.subr.bf16.mxu0 %v529_v1  ;;  %v532_v4 = vld [vmem:[#allocation5 + $0x8] sm:$0xff]   ;;  %v533_v5 = vld [vmem:[#allocation5 + $0x50] sm:$0xff]  }
  0x3a   :  { %468 = vmatpush3.bf16.msra.mxu0 %v530_v2  ;;  %v534_v6 = vld [vmem:[#allocation5 + $0x10] sm:$0xff]   ;;  %v535_v7 = vld [vmem:[#allocation5 + $0x58] sm:$0xff]   ;;  %v537_v9 = vld [vmem:[#allocation5 + $0x60] sm:$0xff]   ;;  %514 = vmatprep.mubr.msk.bf16.mxu1 %vm661_vm0, %v660_v0 }
  0x3b   :  { %469 = vmatprep.subr.bf16.mxu0 %v531_v3  ;;  %v536_v8 = vld [vmem:[#allocation5 + $0x18] sm:$0xff]   ;;  %v538_v10 = vld [vmem:[#allocation5 + $0x20] sm:$0xff]   ;;  %v539_v11 = vld [vmem:[#allocation5 + $0x68] sm:$0xff]  }
  0x3c   :  { %v540_v12 = vld [vmem:[#allocation5 + $0x28] sm:$0xff]   ;;  %v559_v13 = vld.sshfl [vmem:[#allocation2] sm:$0xff pattern:$0x76325410]  ;;  %v547_v16 = vld [vmem:[#allocation7] sm:$0xff]  }
  0x3d   :  { %v560_v14 = vld.sshfl [vmem:[#allocation2 + $0x8] sm:$0xff pattern:$0x76325410]  ;;  %v541_v15 = vld [vmem:[#allocation5 + $0x70] sm:$0xff]   ;;  %v548_v17 = vld [vmem:[#allocation7 + $0x8] sm:$0xff]   ;;  %499 = vmatpush3.bf16.msra.mxu1 %v547_v16 }
  0x3e   :  { %470 = vmatpush3.bf16.msra.mxu0 %v532_v4  ;;  %v542_v18 = vld [vmem:[#allocation5 + $0x30] sm:$0xff]   ;;  %v94_v19 = vcombine.high %v559_v13, %v560_v14  ;;  %500 = vmatprep.subr.bf16.mxu1 %v660_v0  ;;  %v543_v21 = vld [vmem:[#allocation5 + $0x78] sm:$0xff]   ;;  %v93_v22 = vcombine.low %v559_v13, %v560_v14  ;;  %v551_v27 = vld [vmem:[#allocation7 + $0x20] sm:$0xff]  }
  0x3f   :  { %471 = vmatprep.subr.bf16.mxu0 %v533_v5  ;;  %v544_v23 = vld [vmem:[#allocation5 + $0x38] sm:$0xff]   ;;  %v549_v25 = vld [vmem:[#allocation7 + $0x10] sm:$0xff]   ;;  %v552_v28 = vld [vmem:[#allocation7 + $0x28] sm:$0xff]  }
  0x40   :  { %v98_v20 = vpack.c.bf16 %v94_v19, %v94_v19  ;;  %v97_v24 = vpack.c.bf16 %v93_v22, %v93_v22  ;;  %v550_v26 = vld [vmem:[#allocation7 + $0x18] sm:$0xff]   ;;  %v553_v29 = vld [vmem:[#allocation7 + $0x30] sm:$0xff]  }
  0x41   :  { %501 = vmatpush3.bf16.msra.mxu1 %v548_v17  ;;  %v554_v30 = vld [vmem:[#allocation7 + $0x38] sm:$0xff]   ;;  %v439_v32 = vld [vmem:[%s793_s2] ss:$0 sm:$0xff] }
  0x42   :  { %472 = vmatpush3.bf16.msra.mxu0 %v534_v6  ;;  %266 = vmatprep.mubr.bf16.mxu0 %v98_v20  ;;  %v456_v44 = vld [vmem:[%s795_s4] ss:$0 sm:$0xff] }
  0x43   :  { %473 = vmatprep.subr.bf16.mxu0 %v535_v7  ;;  %502 = vmatprep.subr.bf16.mxu1 %v660_v0  ;;  %v465_v59 = vld [vmem:[%s796_s5] ss:$0 sm:$0xff] }
  0x44   :  { %v466_v61 = vld [vmem:[%s797_s6] ss:$0 sm:$0xff] }
  0x45   :  { %503 = vmatpush3.bf16.msra.mxu1 %v549_v25 }
  0x46   :  { %474 = vmatpush3.bf16.msra.mxu0 %v536_v8  ;;  %504 = vmatprep.subr.bf16.mxu1 %v660_v0 }
  0x47   :  { %475 = vmatprep.subr.bf16.mxu0 %v537_v9 }
  0x49   :  { %505 = vmatpush3.bf16.msra.mxu1 %v550_v26 }
  0x4a   :  { %476 = vmatpush3.bf16.msra.mxu0 %v538_v10  ;;  %506 = vmatprep.subr.bf16.mxu1 %v660_v0 }
  0x4b   :  { %477 = vmatprep.subr.bf16.mxu0 %v539_v11 }
  0x4d   :  { %507 = vmatpush3.bf16.msra.mxu1 %v551_v27 }
  0x4e   :  { %478 = vmatpush3.bf16.msra.mxu0 %v540_v12  ;;  %508 = vmatprep.subr.bf16.mxu1 %v660_v0 }
  0x4f   :  { %479 = vmatprep.subr.bf16.mxu0 %v541_v15 }
  0x51   :  { %509 = vmatpush3.bf16.msra.mxu1 %v552_v28 }
  0x52   :  { %480 = vmatpush3.bf16.msra.mxu0 %v542_v18  ;;  %510 = vmatprep.subr.bf16.mxu1 %v660_v0 }
  0x53   :  { %481 = vmatprep.subr.bf16.mxu0 %v543_v21 }
  0x55   :  { %511 = vmatpush3.bf16.msra.mxu1 %v553_v29 }
  0x56   :  { %482 = vmatpush3.bf16.msra.mxu0 %v544_v23  ;;  %512 = vmatprep.subr.bf16.mxu1 %v660_v0 }
  0x59   :  { %267 = vmatmul.mubr.bf16.vlgmr.msra.gmra.mrb[0].mxu0 %v97_v24  ;;  %513 = vmatpush3.bf16.msra.mxu1 %v554_v30 }
 0x12c   :  { %v483_v31 = vpop.f32.mrb[0].mxu0 }
 0x12d   :  { %v484_v33 = vpop.f32.mrb[1].mxu0 }
 0x12e   :  { %v485_v34 = vadd.f32 %v484_v33, %v483_v31  ;;  %v486_v35 = vpop.f32.mrb[2].mxu0 }
 0x12f   :  { %v487_v36 = vpop.f32.mrb[3].mxu0 }
 0x130   :  { %v269_v37 = vadd.f32 %v485_v34, %v439_v32 }
 0x132   :  { %v275_v38 = vmul.f32 0.70710677, %v269_v37  ;;  %v274_v40 = vmul.f32 0.5, %v269_v37 }
 0x134   :  { %555 = verf.f32 %v275_v38 }
 0x13e   :  { %v556_v39 = vpop.eup %555 }
 0x13f   :  { %v277_v41 = vadd.f32 1.0, %v556_v39 }
 0x141   :  { %v278_v42 = vmul.f32 %v277_v41, %v274_v40 }
 0x143   :  { %v279_v43 = vpack.c.bf16 %v278_v42, %v278_v42 }
 0x145   :  { %515 = vmatmul.mubr.bf16.vlgmr.msra.gmra.mrb[0].mxu1 %v279_v43 }
 0x218   :  { %v385_v45 = vpop.f32.mrb[0].mxu1 }
 0x219   :  { %v386_v46 = vadd.f32 %v456_v44, %v385_v45  ;;  %v516_v47 = vpop.f32.mrb[1].mxu1 }
 0x21a   :  { %v388_v48 = vpop.f32.mrb[2].mxu1 }
 0x21b   :  { %v517_v49 = vpop.f32.mrb[3].mxu1  ;;  %v391_v50 = vadd.f32 %v386_v46, %v269_v37 }
 0x21d   :  { %392 = vadd.xlane.f32.xlu0 %v391_v50 }
 0x2aa   :  { %v393_v51 = vpop.xlane.xlu0 %392 }
 0x2ab   :  { %v395_v52 = vmul.f32 0.0078125, %v393_v51 }
 0x2ad   :  { %v396_v53 = vsub.f32 %v391_v50, %v395_v52 }
 0x2af   :  { %v397_v54 = vmul.f32 %v396_v53, %v396_v53 }
 0x2b1   :  { %398 = vadd.xlane.f32.xlu0 %v397_v54 }
 0x33e   :  { %v399_v55 = vpop.xlane.xlu0 %398 }
 0x33f   :  { %v400_v56 = vmul.f32 0.0078125, %v399_v55 }
 0x341   :  { %v401_v57 = vadd.f32 1e-05, %v400_v56 }
 0x343   :  { %557 = vrsqrt.f32 %v401_v57 }
 0x34d   :  { %v558_v58 = vpop.eup %557 }
 0x34e   :  { %v403_v60 = vmul.f32 %v558_v58, %v396_v53 }
 0x350   :  { %v411_v62 = vmul.f32 %v465_v59, %v403_v60 }
 0x352   :  { %v419_v63 = vadd.f32 %v466_v61, %v411_v62 }
 0x354   :  { %420 = vst [vmem:[#allocation8] sm:$0xff] %v419_v63 }
 0x355   :  { %425 = vsyncadd [#allocation4], 96  ;;  %s662_s20 = smov [#allocation8]  }
 0x356   :  { %s426_s21 = sshll.u32 %s662_s20, 4  ;;  %s427_s21 = int_to_ptr.vmem [resolvable:$true] %s426_s21 }
 0x357   :  { %s627_s22 = scalar_lea.vmem %s427_s21, 32  ;;  %s631_s23 = scalar_lea.vmem %s427_s21, 128 }
 0x358   :  { %p628_p10 = scmp.ne.s32.totalorder %s427_s21, %s627_s22  ;;  %p632_p11 = scmp.lt.s32.totalorder %s427_s21, %s427_s21 }
 0x359   :  { %p633_p12 = scmp.lt.s32.totalorder %s631_s23, %s627_s22 }
 0x35b   :  { %p634_p13 = por %p633_p12, %p632_p11 }
 0x35d   :  { %p635_p0 = pnand %p634_p13, %p628_p10 }
 0x35f   :  { %638 = shalt.err (!%p635_p0)
}
 0x360   :  { %s639_s1 = scalar_lea.hbm %s798_s7, 32 }
 0x361   :  { %p640_p1 = scmp.ne.s32.totalorder %s798_s7, %s639_s1  ;;  %p643_p2 = scmp.lt.u32.totalorder %s639_s1, %s798_s7 }
 0x363   :  { %p645_p3 = pnand %p643_p2, %p640_p1 }
 0x365   :  { %648 = shalt.err (!%p645_p3)
}
 0x366   :  { %s663_s29 = smov 32   ;;  %s664_s30 = smov 2  }
 0x367   :  { %432 = dma.vmem_to_hbm [thread:$0]  %s427_s21, 32, %s798_s7, [#allocation4], %s663_s29, %s663_s29, %s664_s30  }
 0x368   :  { %653 = dma.done.wait [#allocation4], 128  }
 0x369   :  { %654 = vsyncadd [#allocation4], 4294967168 }
 0x36a   :  { %436 = vsyncpa [#allocation3], 1 }
 0x36b   :  { %437 = vsyncpa [#allocation6], 1 }
 0x36c   :  { %438 = vsyncpa [#allocation4], 1 }

// kernel: tpu_custom_call.1
= control target key start
LH: loop header
LB: loop body
LE: loop exit
PB: predicated region body
PF: predicated region fallthrough
CT: control target
= control target key end

     0   :  { %12 = vsyncpa [#allocation3], 0  ;;  %s791_s0 = inlined_call_operand.hbm [shape: f32[2,256], index: 0, kind: input, shape index: {}]   ;;  %s792_s1 = inlined_call_operand.hbm [shape: bf16[256,128], index: 1, kind: input, shape index: {}]   ;;  %s793_s2 = inlined_call_operand.vmem [shape: f32[1,128], index: 2, kind: input, shape index: {}]   ;;  %s794_s3 = inlined_call_operand.hbm [shape: bf16[128,128], index: 3, kind: input, shape index: {}]   ;;  %s795_s4 = inlined_call_operand.vmem [shape: f32[1,128], index: 4, kind: input, shape index: {}]   ;;  %s796_s5 = inlined_call_operand.vmem [shape: f32[1,128], index: 5, kind: input, shape index: {}]   ;;  %s797_s6 = inlined_call_operand.vmem [shape: f32[1,128], index: 6, kind: input, shape index: {}]   ;;  %s798_s7 = inlined_call_operand.hbm [shape: f32[2,128], index: 7, kind: output, shape index: {}]  }
   0x1   :  { %13 = vsyncpa [#allocation6], 0 }
   0x2   :  { %14 = vsyncpa [#allocation4], 0 }
   0x3   :  { %19 = vsyncadd [#allocation3], 192  ;;  %s655_s24 = smov [#allocation5]   ;;  %s656_s26 = smov [#allocation2]  }
   0x4   :  { %s32_s25 = sshll.u32 %s655_s24, 4  ;;  %s20_s27 = sshll.u32 %s656_s26, 4  ;;  %s33_s25 = int_to_ptr.vmem [resolvable:$true] %s32_s25  ;;  %s705_s27 = int_to_ptr.vmem [resolvable:$true] %s20_s27 }
   0x5   :  { %s561_s30 = scalar_lea.hbm %s792_s1, 2048 }
   0x6   :  { %p562_p0 = scmp.ne.s32.totalorder %s792_s1, %s561_s30  ;;  %p565_p1 = scmp.lt.u32.totalorder %s561_s30, %s792_s1 }
   0x8   :  { %p567_p2 = pnand %p565_p1, %p562_p0 }
   0xa   :  { %570 = shalt.err (!%p567_p2)
}
   0xb   :  { %s571_s12 = scalar_lea.vmem %s33_s25, 2048  ;;  %p576_p4 = scmp.lt.s32.totalorder %s33_s25, %s33_s25 }
   0xc   :  { %p572_p3 = scmp.ne.s32.totalorder %s33_s25, %s571_s12  ;;  %p577_p5 = scmp.lt.s32.totalorder %s571_s12, %s571_s12 }
   0xe   :  { %p578_p6 = por %p577_p5, %p576_p4 }
  0x10   :  { %p579_p7 = pnand %p578_p6, %p572_p3 }
  0x12   :  { %582 = shalt.err (!%p579_p7)
}
  0x13   :  { %s657_s13 = smov 64   ;;  %s658_s14 = smov 4  }
  0x14   :  { %38 = dma.hbm_to_vmem [thread:$0]  %s792_s1, 2048, %s33_s25, [#allocation6], %s657_s13, %s657_s13, %s658_s14  }
  0x15   :  { %s583_s19 = scalar_lea.hbm %s791_s0, 64 }
  0x16   :  { %p584_p8 = scmp.ne.s32.totalorder %s791_s0, %s583_s19  ;;  %p587_p9 = scmp.lt.u32.totalorder %s583_s19, %s791_s0 }
  0x18   :  { %p589_p10 = pnand %p587_p9, %p584_p8 }
  0x1a   :  { %592 = shalt.err (!%p589_p10)
}
  0x1b   :  { %s593_s24 = scalar_lea.vmem %s705_s27, 64  ;;  %s597_s1 = scalar_lea.vmem %s705_s27, 256 }
  0x1c   :  { %p594_p11 = scmp.ne.s32.totalorder %s705_s27, %s593_s24  ;;  %p598_p12 = scmp.lt.s32.totalorder %s705_s27, %s705_s27 }
  0x1d   :  { %p599_p13 = scmp.lt.s32.totalorder %s597_s1, %s593_s24 }
  0x1f   :  { %p600_p0 = por %p599_p13, %p598_p12 }
  0x21   :  { %p601_p1 = pnand %p600_p0, %p594_p11 }
  0x23   :  { %604 = shalt.err (!%p601_p1)
}
  0x24   :  { %26 = dma.hbm_to_vmem [thread:$0]  %s791_s0, 64, %s705_s27, [#allocation3], %s657_s13, %s657_s13, %s658_s14  }
  0x25   :  { %s659_s28 = smov [#allocation7]   ;;  %s605_s9 = scalar_lea.hbm %s794_s3, 1024 }
  0x26   :  { %s46_s29 = sshll.u32 %s659_s28, 4  ;;  %p606_p2 = scmp.ne.s32.totalorder %s794_s3, %s605_s9  ;;  %s47_s29 = int_to_ptr.vmem [resolvable:$true] %s46_s29 }
  0x27   :  { %p609_p3 = scmp.lt.u32.totalorder %s605_s9, %s794_s3 }
  0x29   :  { %p611_p4 = pnand %p609_p3, %p606_p2 }
  0x2b   :  { %614 = shalt.err (!%p611_p4)
}
  0x2c   :  { %s615_s16 = scalar_lea.vmem %s47_s29, 1024  ;;  %p620_p6 = scmp.lt.s32.totalorder %s47_s29, %s47_s29 }
  0x2d   :  { %p616_p5 = scmp.ne.s32.totalorder %s47_s29, %s615_s16  ;;  %p621_p7 = scmp.lt.s32.totalorder %s615_s16, %s615_s16 }
  0x2f   :  { %p622_p8 = por %p621_p7, %p620_p6 }
  0x31   :  { %p623_p9 = pnand %p622_p8, %p616_p5 }
  0x33   :  { %626 = shalt.err (!%p623_p9)
}
  0x34   :  { %52 = dma.hbm_to_vmem [thread:$0]  %s794_s3, 1024, %s47_s29, [#allocation6], %s657_s13, %s657_s13, %s658_s14  }
  0x35   :  { %649 = dma.done.wait [#allocation3], 256  }
  0x36   :  { %650 = vsyncadd [#allocation3], 4294967040 }
  0x37   :  { %651 = dma.done.wait [#allocation6], 3072  }
  0x38   :  { %652 = vsyncadd [#allocation6], 4294964224  ;;  %v660_v0 = vmov 0.0   ;;  %v529_v1 = vld [vmem:[#allocation5 + $0x40] sm:$0xff]   ;;  %v531_v3 = vld [vmem:[#allocation5 + $0x48] sm:$0xff]   ;;  %vm661_vm0 = vmmov 0  }
  0x39   :  { %498 = vmatprep.subr.bf16.mxu1 %v660_v0  ;;  %v530_v2 = vld [vmem:[#allocation5] sm:$0xff]   ;;  %467 = vmatprep.subr.bf16.mxu0 %v529_v1  ;;  %v532_v4 = vld [vmem:[#allocation5 + $0x8] sm:$0xff]   ;;  %v533_v5 = vld [vmem:[#allocation5 + $0x50] sm:$0xff]  }
  0x3a   :  { %468 = vmatpush3.bf16.msra.mxu0 %v530_v2  ;;  %v534_v6 = vld [vmem:[#allocation5 + $0x10] sm:$0xff]   ;;  %v535_v7 = vld [vmem:[#allocation5 + $0x58] sm:$0xff]   ;;  %v537_v9 = vld [vmem:[#allocation5 + $0x60] sm:$0xff]   ;;  %514 = vmatprep.mubr.msk.bf16.mxu1 %vm661_vm0, %v660_v0 }
  0x3b   :  { %469 = vmatprep.subr.bf16.mxu0 %v531_v3  ;;  %v536_v8 = vld [vmem:[#allocation5 + $0x18] sm:$0xff]   ;;  %v538_v10 = vld [vmem:[#allocation5 + $0x20] sm:$0xff]   ;;  %v539_v11 = vld [vmem:[#allocation5 + $0x68] sm:$0xff]  }
  0x3c   :  { %v540_v12 = vld [vmem:[#allocation5 + $0x28] sm:$0xff]   ;;  %v559_v13 = vld.sshfl [vmem:[#allocation2] sm:$0xff pattern:$0x76325410]  ;;  %v547_v16 = vld [vmem:[#allocation7] sm:$0xff]  }
  0x3d   :  { %v560_v14 = vld.sshfl [vmem:[#allocation2 + $0x8] sm:$0xff pattern:$0x76325410]  ;;  %v541_v15 = vld [vmem:[#allocation5 + $0x70] sm:$0xff]   ;;  %v548_v17 = vld [vmem:[#allocation7 + $0x8] sm:$0xff]   ;;  %499 = vmatpush3.bf16.msra.mxu1 %v547_v16 }
  0x3e   :  { %470 = vmatpush3.bf16.msra.mxu0 %v532_v4  ;;  %v542_v18 = vld [vmem:[#allocation5 + $0x30] sm:$0xff]   ;;  %v94_v19 = vcombine.high %v559_v13, %v560_v14  ;;  %500 = vmatprep.subr.bf16.mxu1 %v660_v0  ;;  %v543_v21 = vld [vmem:[#allocation5 + $0x78] sm:$0xff]   ;;  %v93_v22 = vcombine.low %v559_v13, %v560_v14  ;;  %v551_v27 = vld [vmem:[#allocation7 + $0x20] sm:$0xff]  }
  0x3f   :  { %471 = vmatprep.subr.bf16.mxu0 %v533_v5  ;;  %v544_v23 = vld [vmem:[#allocation5 + $0x38] sm:$0xff]   ;;  %v549_v25 = vld [vmem:[#allocation7 + $0x10] sm:$0xff]   ;;  %v552_v28 = vld [vmem:[#allocation7 + $0x28] sm:$0xff]  }
  0x40   :  { %v98_v20 = vpack.c.bf16 %v94_v19, %v94_v19  ;;  %v97_v24 = vpack.c.bf16 %v93_v22, %v93_v22  ;;  %v550_v26 = vld [vmem:[#allocation7 + $0x18] sm:$0xff]   ;;  %v553_v29 = vld [vmem:[#allocation7 + $0x30] sm:$0xff]  }
  0x41   :  { %501 = vmatpush3.bf16.msra.mxu1 %v548_v17  ;;  %v554_v30 = vld [vmem:[#allocation7 + $0x38] sm:$0xff]   ;;  %v439_v32 = vld [vmem:[%s793_s2] ss:$0 sm:$0xff] }
  0x42   :  { %472 = vmatpush3.bf16.msra.mxu0 %v534_v6  ;;  %266 = vmatprep.mubr.bf16.mxu0 %v98_v20  ;;  %v456_v44 = vld [vmem:[%s795_s4] ss:$0 sm:$0xff] }
  0x43   :  { %473 = vmatprep.subr.bf16.mxu0 %v535_v7  ;;  %502 = vmatprep.subr.bf16.mxu1 %v660_v0  ;;  %v465_v59 = vld [vmem:[%s796_s5] ss:$0 sm:$0xff] }
  0x44   :  { %v466_v61 = vld [vmem:[%s797_s6] ss:$0 sm:$0xff] }
  0x45   :  { %503 = vmatpush3.bf16.msra.mxu1 %v549_v25 }
  0x46   :  { %474 = vmatpush3.bf16.msra.mxu0 %v536_v8  ;;  %504 = vmatprep.subr.bf16.mxu1 %v660_v0 }
  0x47   :  { %475 = vmatprep.subr.bf16.mxu0 %v537_v9 }
  0x49   :  { %505 = vmatpush3.bf16.msra.mxu1 %v550_v26 }
  0x4a   :  { %476 = vmatpush3.bf16.msra.mxu0 %v538_v10  ;;  %506 = vmatprep.subr.bf16.mxu1 %v660_v0 }
  0x4b   :  { %477 = vmatprep.subr.bf16.mxu0 %v539_v11 }
  0x4d   :  { %507 = vmatpush3.bf16.msra.mxu1 %v551_v27 }
  0x4e   :  { %478 = vmatpush3.bf16.msra.mxu0 %v540_v12  ;;  %508 = vmatprep.subr.bf16.mxu1 %v660_v0 }
  0x4f   :  { %479 = vmatprep.subr.bf16.mxu0 %v541_v15 }
  0x51   :  { %509 = vmatpush3.bf16.msra.mxu1 %v552_v28 }
  0x52   :  { %480 = vmatpush3.bf16.msra.mxu0 %v542_v18  ;;  %510 = vmatprep.subr.bf16.mxu1 %v660_v0 }
  0x53   :  { %481 = vmatprep.subr.bf16.mxu0 %v543_v21 }
  0x55   :  { %511 = vmatpush3.bf16.msra.mxu1 %v553_v29 }
  0x56   :  { %482 = vmatpush3.bf16.msra.mxu0 %v544_v23  ;;  %512 = vmatprep.subr.bf16.mxu1 %v660_v0 }
  0x59   :  { %267 = vmatmul.mubr.bf16.vlgmr.msra.gmra.mrb[0].mxu0 %v97_v24  ;;  %513 = vmatpush3.bf16.msra.mxu1 %v554_v30 }
 0x12c   :  { %v483_v31 = vpop.f32.mrb[0].mxu0 }
 0x12d   :  { %v484_v33 = vpop.f32.mrb[1].mxu0 }
 0x12e   :  { %v485_v34 = vadd.f32 %v484_v33, %v483_v31  ;;  %v486_v35 = vpop.f32.mrb[2].mxu0 }
 0x12f   :  { %v487_v36 = vpop.f32.mrb[3].mxu0 }
 0x130   :  { %v269_v37 = vadd.f32 %v485_v34, %v439_v32 }
 0x132   :  { %v275_v38 = vmul.f32 0.70710677, %v269_v37  ;;  %v274_v40 = vmul.f32 0.5, %v269_v37 }
 0x134   :  { %555 = verf.f32 %v275_v38 }
 0x13e   :  { %v556_v39 = vpop.eup %555 }
 0x13f   :  { %v277_v41 = vadd.f32 1.0, %v556_v39 }
 0x141   :  { %v278_v42 = vmul.f32 %v277_v41, %v274_v40 }
 0x143   :  { %v279_v43 = vpack.c.bf16 %v278_v42, %v278_v42 }
 0x145   :  { %515 = vmatmul.mubr.bf16.vlgmr.msra.gmra.mrb[0].mxu1 %v279_v43 }
 0x218   :  { %v385_v45 = vpop.f32.mrb[0].mxu1 }
 0x219   :  { %v386_v46 = vadd.f32 %v456_v44, %v385_v45  ;;  %v516_v47 = vpop.f32.mrb[1].mxu1 }
 0x21a   :  { %v388_v48 = vpop.f32.mrb[2].mxu1 }
 0x21b   :  { %v517_v49 = vpop.f32.mrb[3].mxu1  ;;  %v391_v50 = vadd.f32 %v386_v46, %v269_v37 }
 0x21d   :  { %392 = vadd.xlane.f32.xlu0 %v391_v50 }
 0x2aa   :  { %v393_v51 = vpop.xlane.xlu0 %392 }
 0x2ab   :  { %v395_v52 = vmul.f32 0.0078125, %v393_v51 }
 0x2ad   :  { %v396_v53 = vsub.f32 %v391_v50, %v395_v52 }
 0x2af   :  { %v397_v54 = vmul.f32 %v396_v53, %v396_v53 }
 0x2b1   :  { %398 = vadd.xlane.f32.xlu0 %v397_v54 }
 0x33e   :  { %v399_v55 = vpop.xlane.xlu0 %398 }
 0x33f   :  { %v400_v56 = vmul.f32 0.0078125, %v399_v55 }
 0x341   :  { %v401_v57 = vadd.f32 1e-05, %v400_v56 }
 0x343   :  { %557 = vrsqrt.f32 %v401_v57 }
 0x34d   :  { %v558_v58 = vpop.eup %557 }
 0x34e   :  { %v403_v60 = vmul.f32 %v558_v58, %v396_v53 }
 0x350   :  { %v411_v62 = vmul.f32 %v465_v59, %v403_v60 }
 0x352   :  { %v419_v63 = vadd.f32 %v466_v61, %v411_v62 }
 0x354   :  { %420 = vst [vmem:[#allocation8] sm:$0xff] %v419_v63 }
 0x355   :  { %425 = vsyncadd [#allocation4], 96  ;;  %s662_s20 = smov [#allocation8]  }
 0x356   :  { %s426_s21 = sshll.u32 %s662_s20, 4  ;;  %s427_s21 = int_to_ptr.vmem [resolvable:$true] %s426_s21 }
 0x357   :  { %s627_s22 = scalar_lea.vmem %s427_s21, 32  ;;  %s631_s23 = scalar_lea.vmem %s427_s21, 128 }
 0x358   :  { %p628_p10 = scmp.ne.s32.totalorder %s427_s21, %s627_s22  ;;  %p632_p11 = scmp.lt.s32.totalorder %s427_s21, %s427_s21 }
 0x359   :  { %p633_p12 = scmp.lt.s32.totalorder %s631_s23, %s627_s22 }
 0x35b   :  { %p634_p13 = por %p633_p12, %p632_p11 }
 0x35d   :  { %p635_p0 = pnand %p634_p13, %p628_p10 }
 0x35f   :  { %638 = shalt.err (!%p635_p0)
}
 0x360   :  { %s639_s1 = scalar_lea.hbm %s798_s7, 32 }
 0x361   :  { %p640_p1 = scmp.ne.s32.totalorder %s798_s7, %s639_s1  ;;  %p643_p2 = scmp.lt.u32.totalorder %s639_s1, %s798_s7 }
 0x363   :  { %p645_p3 = pnand %p643_p2, %p640_p1 }
 0x365   :  { %648 = shalt.err (!%p645_p3)
}
 0x366   :  { %s663_s29 = smov 32   ;;  %s664_s30 = smov 2  }
 0x367   :  { %432 = dma.vmem_to_hbm [thread:$0]  %s427_s21, 32, %s798_s7, [#allocation4], %s663_s29, %s663_s29, %s664_s30  }
 0x368   :  { %653 = dma.done.wait [#allocation4], 128  }
 0x369   :  { %654 = vsyncadd [#allocation4], 4294967168 }
 0x36a   :  { %436 = vsyncpa [#allocation3], 1 }
 0x36b   :  { %437 = vsyncpa [#allocation6], 1 }
 0x36c   :  { %438 = vsyncpa [#allocation4], 1 }

</bundles_post_ra>
